<compile_context>
chip_gen: v7x
topology: tpu7x:2x2x1
jax: 0.10.0
libtpu: 0.0.40
codegen_flags: <defaults>
</compile_context>

<pallas_src>
import functools

import jax
import jax.numpy as jnp
from jax.experimental import pallas as pl
from jax.experimental.pallas import tpu as pltpu

NEG_SLOPE = 0.2   # LeakyReLU(0.2)
HID = 128         # hidden width of the QHead
PAD_N = 128       # packed-output lane width (lane-dense, single 128 block)
SPLIT = 64        # mu columns: [0:dim_c], var columns: [SPLIT:SPLIT+dim_c]


# ----------------------------------------------------------------------------
# Fused Pallas kernel: Linear+LeakyReLU, then one packed output head with exp
# applied to the var half via a lane mask.  Single VMEM block, one full-tile
# store.
# ----------------------------------------------------------------------------
def _qhead_kernel(x_ref, w1_ref, b1_ref, w2_ref, b2_ref, o_ref):
    # fc_qnet: spectral-normalized Linear(128,128) + LeakyReLU(0.2)
    h = jnp.dot(x_ref[...].astype(jnp.bfloat16), w1_ref[...],
                preferred_element_type=jnp.float32)
    h = h + b1_ref[...]
    h = jnp.maximum(h, NEG_SLOPE * h)            # LeakyReLU(0.2)

    # packed heads in a single 128-lane block:
    #   lanes [0:dim_c]            -> mu
    #   lanes [SPLIT:SPLIT+dim_c]  -> var = exp(fc_var)
    y = jnp.dot(h.astype(jnp.bfloat16), w2_ref[...],
                preferred_element_type=jnp.float32)
    y = y + b2_ref[...]

    lane = jax.lax.broadcasted_iota(jnp.int32, y.shape, dimension=1)
    o_ref[...] = jnp.where(lane >= SPLIT, jnp.exp(y), y)   # one full-tile vst


def _qhead_pallas(x, w1, b1, w2, b2):
    m = x.shape[0]
    inputs = (x, w1, b1, w2, b2)
    # block_shape == full array dims -> exempt from (8,128) divisibility;
    # last dim is 128 everywhere anyway (lane-dense).
    in_specs = [pl.BlockSpec(a.shape, lambda i: (0, 0)) for a in inputs]
    return pl.pallas_call(
        _qhead_kernel,
        grid=(1,),
        in_specs=in_specs,
        out_specs=pl.BlockSpec((m, PAD_N), lambda i: (0, 0)),
        out_shape=jax.ShapeDtypeStruct((m, PAD_N), jnp.float32),
        compiler_params=pltpu.CompilerParams(
            dimension_semantics=("arbitrary",)),
    )(*inputs)


# ----------------------------------------------------------------------------
# Wrapper: run the fused kernel, slice mu / var out of the packed block.
# ----------------------------------------------------------------------------
@functools.partial(jax.jit, static_argnames=("dim_c",))
def qhead_forward(prep, x, *, dim_c):
    out = _qhead_pallas(x, prep["w1"], prep["b1"], prep["w2"], prep["b2"])
    mu = out[:, :dim_c]
    var = out[:, SPLIT:SPLIT + dim_c]
    return mu, var


# ----------------------------------------------------------------------------
# Parameter preparation (done ONCE, outside the per-forward path):
#   - spectral-normalize the fc_qnet weight (power iteration),
#   - transpose all weights to [in, out],
#   - pack fc_mu / fc_var into one lane-dense [128, 128] matrix,
#   - cast MXU operands to bf16, keep biases in f32.
# ----------------------------------------------------------------------------
def _spectral_normalize(w, n_iter=30):
    # w: [out, in] (PyTorch layout); sigma via power iteration, like
    # torch.nn.utils.spectral_norm's reparameterization (converged at prep
    # time; PyTorch instead does 1 iteration per training forward).
    u = jnp.ones((w.shape[0],), jnp.float32)
    def body(_, u):
        v = w.T @ u
        v = v / (jnp.linalg.norm(v) + 1e-12)
        u = w @ v
        u = u / (jnp.linalg.norm(u) + 1e-12)
        return u
    u = jax.lax.fori_loop(0, n_iter, body, u)
    v = w.T @ u
    v = v / (jnp.linalg.norm(v) + 1e-12)
    sigma = u @ (w @ v)
    return w / sigma


def prepare_params(raw, dim_c):
    assert 2 * dim_c <= PAD_N and dim_c <= SPLIT, "mu/var must fit one 128-lane block"
    w1 = _spectral_normalize(raw["fc_qnet_w"]).T                 # [128,128] (in,out)
    b1 = raw["fc_qnet_b"].reshape(1, HID).astype(jnp.float32)

    w2 = jnp.zeros((HID, PAD_N), jnp.float32)
    w2 = w2.at[:, :dim_c].set(raw["fc_mu_w"].T)                  # mu head
    w2 = w2.at[:, SPLIT:SPLIT + dim_c].set(raw["fc_var_w"].T)    # var head
    b2 = jnp.zeros((1, PAD_N), jnp.float32)
    b2 = b2.at[0, :dim_c].set(raw["fc_mu_b"])
    b2 = b2.at[0, SPLIT:SPLIT + dim_c].set(raw["fc_var_b"])

    return {
        "w1": w1.astype(jnp.bfloat16),
        "b1": b1,
        "w2": w2.astype(jnp.bfloat16),
        "b2": b2,
    }


# ----------------------------------------------------------------------------
# Deterministic synthetic parameter init (PyTorch Linear layouts: W [out, in]).
# ----------------------------------------------------------------------------
def init_params(key, dim_c):
    keys = jax.random.split(key, 6)
    def nrm(k, shape, scale=0.05):
        return scale * jax.random.normal(k, shape, dtype=jnp.float32)
    return {
        "fc_qnet_w": nrm(keys[0], (HID, HID)),
        "fc_qnet_b": nrm(keys[1], (HID,)),
        "fc_mu_w":   nrm(keys[2], (dim_c, HID)),
        "fc_mu_b":   nrm(keys[3], (dim_c,)),
        "fc_var_w":  nrm(keys[4], (dim_c, HID)),
        "fc_var_b":  nrm(keys[5], (dim_c,)),
    }


def _reference_forward(raw, x, dim_c):
    # Pure-JAX f32 reference with the same (converged) spectral norm.
    w1 = _spectral_normalize(raw["fc_qnet_w"])
    h = x @ w1.T + raw["fc_qnet_b"]
    h = jnp.where(h >= 0.0, h, NEG_SLOPE * h)
    mu = h @ raw["fc_mu_w"].T + raw["fc_mu_b"]
    var = jnp.exp(h @ raw["fc_var_w"].T + raw["fc_var_b"])
    return mu, var


if __name__ == "__main__":
    key = jax.random.PRNGKey(0)
    k_params, k_x = jax.random.split(key, 2)

    dim_c = 5
    B = 2

    raw = init_params(k_params, dim_c)
    prep = prepare_params(raw, dim_c)                   # one-time weight prep
    x = jax.random.normal(k_x, (B, HID), dtype=jnp.float32)

    mu, var = qhead_forward(prep, x, dim_c=dim_c)
    mu, var = jax.block_until_ready((mu, var))

    assert mu.shape == (B, dim_c), mu.shape
    assert var.shape == (B, dim_c), var.shape
    assert jnp.all(jnp.isfinite(mu)) and jnp.all(jnp.isfinite(var))
    assert jnp.all(var > 0.0)                           # exp output must be positive

    # loose tolerance: kernel runs the GEMMs in bf16 (f32 accumulation)
    mu_ref, var_ref = _reference_forward(raw, x, dim_c)
    assert jnp.allclose(mu, mu_ref, rtol=5e-2, atol=5e-2)
    assert jnp.allclose(var, var_ref, rtol=5e-2, atol=5e-2)

    print("KERNEL_OK")
</pallas_src>

<mosaic_0001>
module attributes {stable_mosaic.version = 11 : i64} {
  func.func @_qhead_kernel(%arg0: i32, %arg1: memref<2x128xf32, #tpu.memory_space<vmem>>, %arg2: memref<128x128xbf16, #tpu.memory_space<vmem>>, %arg3: memref<1x128xf32, #tpu.memory_space<vmem>>, %arg4: memref<128x128xbf16, #tpu.memory_space<vmem>>, %arg5: memref<1x128xf32, #tpu.memory_space<vmem>>, %arg6: memref<2x128xf32, #tpu.memory_space<vmem>>) attributes {dimension_semantics = [#tpu.dimension_semantics<arbitrary>], iteration_bounds = array<i64: 1>, scalar_prefetch = 0 : i64, scratch_operands = 0 : i64, tpu.core_type = #tpu.core_type<tc>, window_params = [{pipeline_mode = #tpu.pipeline_mode<synchronous>, transform_indices = @transform_0, window_bounds = array<i64: 2, 128>}, {pipeline_mode = #tpu.pipeline_mode<synchronous>, transform_indices = @transform_1, window_bounds = array<i64: 128, 128>}, {pipeline_mode = #tpu.pipeline_mode<synchronous>, transform_indices = @transform_2, window_bounds = array<i64: 1, 128>}, {pipeline_mode = #tpu.pipeline_mode<synchronous>, transform_indices = @transform_3, window_bounds = array<i64: 128, 128>}, {pipeline_mode = #tpu.pipeline_mode<synchronous>, transform_indices = @transform_4, window_bounds = array<i64: 1, 128>}, {pipeline_mode = #tpu.pipeline_mode<synchronous>, transform_indices = @transform_5, window_bounds = array<i64: 2, 128>}]} {
    %c0 = arith.constant 0 : index
    %c0_0 = arith.constant 0 : index
    %0 = vector.load %arg1[%c0, %c0_0] : memref<2x128xf32, #tpu.memory_space<vmem>>, vector<2x128xf32>
    %1 = arith.truncf %0 : vector<2x128xf32> to vector<2x128xbf16>
    %c0_1 = arith.constant 0 : index
    %c0_2 = arith.constant 0 : index
    %2 = vector.load %arg2[%c0_1, %c0_2] : memref<128x128xbf16, #tpu.memory_space<vmem>>, vector<128x128xbf16>
    %cst = arith.constant dense<0.000000e+00> : vector<2x128xf32>
    %3 = tpu.matmul %1, %2, %cst {dimension_numbers = #tpu.dot_dimension_numbers<[1], [0], [0], [1], [0, 0, 1, 1], [], []>} : vector<2x128xbf16>, vector<128x128xbf16>, vector<2x128xf32> -> vector<2x128xf32>
    %c0_3 = arith.constant 0 : index
    %c0_4 = arith.constant 0 : index
    %4 = vector.load %arg3[%c0_3, %c0_4] : memref<1x128xf32, #tpu.memory_space<vmem>>, vector<1x128xf32>
    %5 = vector.broadcast %4 : vector<1x128xf32> to vector<2x128xf32>
    %6 = arith.addf %3, %5 : vector<2x128xf32>
    %cst_5 = arith.constant 2.000000e-01 : f32
    %7 = vector.broadcast %cst_5 : f32 to vector<2x128xf32>
    %8 = arith.mulf %7, %6 : vector<2x128xf32>
    %9 = arith.maximumf %6, %8 : vector<2x128xf32>
    %10 = arith.truncf %9 : vector<2x128xf32> to vector<2x128xbf16>
    %c0_6 = arith.constant 0 : index
    %c0_7 = arith.constant 0 : index
    %11 = vector.load %arg4[%c0_6, %c0_7] : memref<128x128xbf16, #tpu.memory_space<vmem>>, vector<128x128xbf16>
    %cst_8 = arith.constant dense<0.000000e+00> : vector<2x128xf32>
    %12 = tpu.matmul %10, %11, %cst_8 {dimension_numbers = #tpu.dot_dimension_numbers<[1], [0], [0], [1], [0, 0, 1, 1], [], []>} : vector<2x128xbf16>, vector<128x128xbf16>, vector<2x128xf32> -> vector<2x128xf32>
    %c0_9 = arith.constant 0 : index
    %c0_10 = arith.constant 0 : index
    %13 = vector.load %arg5[%c0_9, %c0_10] : memref<1x128xf32, #tpu.memory_space<vmem>>, vector<1x128xf32>
    %14 = vector.broadcast %13 : vector<1x128xf32> to vector<2x128xf32>
    %15 = arith.addf %12, %14 : vector<2x128xf32>
    %16 = tpu.iota {dimensions = array<i32: 1>} : vector<2x128xi32>
    %c64_i32 = arith.constant 64 : i32
    %17 = vector.broadcast %c64_i32 : i32 to vector<2x128xi32>
    %18 = arith.cmpi sge, %16, %17 : vector<2x128xi32>
    %19 = math.exp %15 : vector<2x128xf32>
    %20 = arith.select %18, %19, %15 : vector<2x128xi1>, vector<2x128xf32>
    %c0_11 = arith.constant 0 : index
    %c0_12 = arith.constant 0 : index
    %21 = vector.load %arg6[%c0_11, %c0_12] : memref<2x128xf32, #tpu.memory_space<vmem>>, vector<2x128xf32>
    tpu.vector_store %arg6[%c0_11, %c0_12], %20 {strides = array<i32>} : memref<2x128xf32, #tpu.memory_space<vmem>>, vector<2x128xf32>,
    return
  }
  func.func @transform_0(%arg0: i32) -> (i32, i32) {
    %c0_i32 = arith.constant 0 : i32
    %c0_i32_0 = arith.constant 0 : i32
    %c0_i32_1 = arith.constant 0 : i32
    return %c0_i32, %c0_i32_0 : i32, i32
  }
  func.func @transform_1(%arg0: i32) -> (i32, i32) {
    %c0_i32 = arith.constant 0 : i32
    %c0_i32_0 = arith.constant 0 : i32
    %c0_i32_1 = arith.constant 0 : i32
    return %c0_i32, %c0_i32_0 : i32, i32
  }
  func.func @transform_2(%arg0: i32) -> (i32, i32) {
    %c0_i32 = arith.constant 0 : i32
    %c0_i32_0 = arith.constant 0 : i32
    %c0_i32_1 = arith.constant 0 : i32
    return %c0_i32, %c0_i32_0 : i32, i32
  }
  func.func @transform_3(%arg0: i32) -> (i32, i32) {
    %c0_i32 = arith.constant 0 : i32
    %c0_i32_0 = arith.constant 0 : i32
    %c0_i32_1 = arith.constant 0 : i32
    return %c0_i32, %c0_i32_0 : i32, i32
  }
  func.func @transform_4(%arg0: i32) -> (i32, i32) {
    %c0_i32 = arith.constant 0 : i32
    %c0_i32_0 = arith.constant 0 : i32
    %c0_i32_1 = arith.constant 0 : i32
    return %c0_i32, %c0_i32_0 : i32, i32
  }
  func.func @transform_5(%arg0: i32) -> (i32, i32) {
    %c0_i32 = arith.constant 0 : i32
    %c0_i32_0 = arith.constant 0 : i32
    %c0_i32_1 = arith.constant 0 : i32
    return %c0_i32, %c0_i32_0 : i32, i32
  }
}

</mosaic_0001>

<bundles_post_ra>
// kernel: qhead_forward.1
= control target key start
LH: loop header
LB: loop body
LE: loop exit
PB: predicated region body
PF: predicated region fallthrough
CT: control target
= control target key end

     0   :  { %10 = vsyncpa [#allocation3], 0  ;;  %s560_s0 = inlined_call_operand.vmem [shape: f32[2,128], index: 0, kind: input, shape index: {}]   ;;  %s561_s1 = inlined_call_operand.hbm [shape: bf16[128,128], index: 1, kind: input, shape index: {}]   ;;  %s562_s2 = inlined_call_operand.hbm [shape: f32[1,128], index: 2, kind: input, shape index: {}]   ;;  %s563_s3 = inlined_call_operand.hbm [shape: bf16[128,128], index: 3, kind: input, shape index: {}]   ;;  %s564_s4 = inlined_call_operand.vmem [shape: f32[1,128], index: 4, kind: input, shape index: {}]   ;;  %s565_s5 = inlined_call_operand.vmem [shape: f32[2,128], index: 5, kind: output, shape index: {}]  }
   0x1   :  { %11 = vsyncpa [#allocation5], 0  ;;  %s471_s18 = smov [#allocation4]   ;;  %s472_s20 = smov [#allocation2]  }
   0x2   :  { %s32_s19 = sshll.u32 %s471_s18, 4  ;;  %s19_s21 = sshll.u32 %s472_s20, 4  ;;  %s33_s19 = int_to_ptr.vmem [resolvable:$true] %s32_s19  ;;  %s508_s21 = int_to_ptr.vmem [resolvable:$true] %s19_s21 }
   0x3   :  { %s401_s24 = scalar_lea.hbm %s562_s2, 16 }
   0x4   :  { %p402_p0 = scmp.ne.s32.totalorder %s562_s2, %s401_s24  ;;  %p405_p1 = scmp.lt.u32.totalorder %s401_s24, %s562_s2 }
   0x6   :  { %p407_p2 = pnand %p405_p1, %p402_p0 }
   0x8   :  { %410 = shalt.err (!%p407_p2)
}
   0x9   :  { %s411_s29 = scalar_lea.vmem %s33_s19, 16  ;;  %s415_s30 = scalar_lea.vmem %s33_s19, 32 }
   0xa   :  { %p412_p3 = scmp.ne.s32.totalorder %s33_s19, %s411_s29  ;;  %p416_p4 = scmp.lt.s32.totalorder %s33_s19, %s33_s19 }
   0xb   :  { %p417_p5 = scmp.lt.s32.totalorder %s415_s30, %s411_s29 }
   0xd   :  { %p418_p6 = por %p417_p5, %p416_p4 }
   0xf   :  { %p419_p7 = pnand %p418_p6, %p412_p3 }
  0x11   :  { %422 = shalt.err (!%p419_p7)
}
  0x12   :  { %35 = dma.hbm_to_vmem [thread:$0]  %s562_s2, 16, %s33_s19, [#allocation5]  }
  0x13   :  { %s423_s10 = scalar_lea.hbm %s561_s1, 1024 }
  0x14   :  { %p424_p8 = scmp.ne.s32.totalorder %s561_s1, %s423_s10  ;;  %p427_p9 = scmp.lt.u32.totalorder %s423_s10, %s561_s1 }
  0x16   :  { %p429_p10 = pnand %p427_p9, %p424_p8 }
  0x18   :  { %432 = shalt.err (!%p429_p10)
}
  0x19   :  { %s433_s15 = scalar_lea.vmem %s508_s21, 1024  ;;  %p438_p12 = scmp.lt.s32.totalorder %s508_s21, %s508_s21 }
  0x1a   :  { %p434_p11 = scmp.ne.s32.totalorder %s508_s21, %s433_s15  ;;  %p439_p13 = scmp.lt.s32.totalorder %s433_s15, %s433_s15 }
  0x1c   :  { %p440_p0 = por %p439_p13, %p438_p12 }
  0x1e   :  { %p441_p1 = pnand %p440_p0, %p434_p11 }
  0x20   :  { %444 = shalt.err (!%p441_p1)
}
  0x21   :  { %s473_s2 = smov 64   ;;  %s474_s16 = smov 4  }
  0x22   :  { %25 = dma.hbm_to_vmem [thread:$0]  %s561_s1, 1024, %s508_s21, [#allocation3], %s473_s2, %s473_s2, %s474_s16  }
  0x23   :  { %s475_s19 = smov [#allocation6]   ;;  %s445_s24 = scalar_lea.hbm %s563_s3, 1024 }
  0x24   :  { %s41_s20 = sshll.u32 %s475_s19, 4  ;;  %p446_p2 = scmp.ne.s32.totalorder %s563_s3, %s445_s24  ;;  %s42_s20 = int_to_ptr.vmem [resolvable:$true] %s41_s20 }
  0x25   :  { %p449_p3 = scmp.lt.u32.totalorder %s445_s24, %s563_s3 }
  0x27   :  { %p451_p4 = pnand %p449_p3, %p446_p2 }
  0x29   :  { %454 = shalt.err (!%p451_p4)
}
  0x2a   :  { %s455_s29 = scalar_lea.vmem %s42_s20, 1024  ;;  %p460_p6 = scmp.lt.s32.totalorder %s42_s20, %s42_s20 }
  0x2b   :  { %p456_p5 = scmp.ne.s32.totalorder %s42_s20, %s455_s29  ;;  %p461_p7 = scmp.lt.s32.totalorder %s455_s29, %s455_s29 }
  0x2d   :  { %p462_p8 = por %p461_p7, %p460_p6 }
  0x2f   :  { %p463_p9 = pnand %p462_p8, %p456_p5 }
  0x31   :  { %466 = shalt.err (!%p463_p9)
}
  0x32   :  { %47 = dma.hbm_to_vmem [thread:$0]  %s563_s3, 1024, %s42_s20, [#allocation5], %s473_s2, %s473_s2, %s474_s16  }
  0x33   :  { %467 = dma.done.wait [#allocation3], 1024  }
  0x34   :  { %468 = vsyncadd [#allocation3], 4294966272 }
  0x35   :  { %469 = dma.done.wait [#allocation5], 1040  }
  0x36   :  { %470 = vsyncadd [#allocation5], 4294966256  ;;  %v476_v0 = vmov 0.0   ;;  %vm477_vm0 = vmmov 0   ;;  %v383_v1 = vld [vmem:[#allocation2] sm:$0xff]   ;;  %v384_v2 = vld [vmem:[#allocation2 + $0x8] sm:$0xff]   ;;  %v287_v35 = vlaneseq }
  0x37   :  { %336 = vmatprep.subr.bf16.mxu0 %v476_v0  ;;  %352 = vmatprep.mubr.msk.bf16.mxu0 %vm477_vm0, %v476_v0  ;;  %v385_v3 = vld [vmem:[#allocation2 + $0x10] sm:$0xff]   ;;  %v391_v4 = vld [vmem:[#allocation6] sm:$0xff]   ;;  %v386_v5 = vld [vmem:[#allocation2 + $0x18] sm:$0xff]  }
  0x38   :  { %356 = vmatprep.subr.bf16.mxu1 %v476_v0  ;;  %372 = vmatprep.mubr.msk.bf16.mxu1 %vm477_vm0, %v476_v0  ;;  %v392_v6 = vld [vmem:[#allocation6 + $0x8] sm:$0xff]   ;;  %v387_v7 = vld [vmem:[#allocation2 + $0x20] sm:$0xff]   ;;  %v393_v8 = vld [vmem:[#allocation6 + $0x10] sm:$0xff]   ;;  %v288_v36 = vand.u32 127, %v287_v35 }
  0x39   :  { %337 = vmatpush3.bf16.msra.mxu0 %v383_v1  ;;  %357 = vmatpush3.bf16.msra.mxu1 %v391_v4  ;;  %v388_v9 = vld [vmem:[#allocation2 + $0x28] sm:$0xff]   ;;  %v394_v10 = vld [vmem:[#allocation6 + $0x18] sm:$0xff]   ;;  %v389_v11 = vld [vmem:[#allocation2 + $0x30] sm:$0xff]  }
  0x3a   :  { %338 = vmatprep.subr.bf16.mxu0 %v476_v0  ;;  %358 = vmatprep.subr.bf16.mxu1 %v476_v0  ;;  %v395_v12 = vld [vmem:[#allocation6 + $0x20] sm:$0xff]   ;;  %v390_v13 = vld [vmem:[#allocation2 + $0x38] sm:$0xff]   ;;  %v60_v14 = vld [vmem:[%s560_s0] sm:$0x3]  ;;  %vm289_vm1 = vcmp.ge.s32.totalorder %v288_v36, 64 }
  0x3b   :  { %v396_v15 = vld [vmem:[#allocation6 + $0x28] sm:$0xff]   ;;  %v61_v16 = vpack.c.bf16 %v60_v14, %v60_v14  ;;  %v397_v17 = vld [vmem:[#allocation6 + $0x30] sm:$0xff]   ;;  %v398_v18 = vld [vmem:[#allocation6 + $0x38] sm:$0xff]  }
  0x3c   :  { %v300_v19 = vld [vmem:[#allocation4] ss:$0 sm:$0xff] }
  0x3d   :  { %339 = vmatpush3.bf16.msra.mxu0 %v384_v2  ;;  %359 = vmatpush3.bf16.msra.mxu1 %v392_v6  ;;  %v309_v28 = vld [vmem:[%s564_s4] ss:$0 sm:$0xff] }
  0x3e   :  { %340 = vmatprep.subr.bf16.mxu0 %v476_v0  ;;  %360 = vmatprep.subr.bf16.mxu1 %v476_v0 }
  0x41   :  { %341 = vmatpush3.bf16.msra.mxu0 %v385_v3  ;;  %361 = vmatpush3.bf16.msra.mxu1 %v393_v8 }
  0x42   :  { %342 = vmatprep.subr.bf16.mxu0 %v476_v0  ;;  %362 = vmatprep.subr.bf16.mxu1 %v476_v0 }
  0x45   :  { %343 = vmatpush3.bf16.msra.mxu0 %v386_v5  ;;  %363 = vmatpush3.bf16.msra.mxu1 %v394_v10 }
  0x46   :  { %344 = vmatprep.subr.bf16.mxu0 %v476_v0  ;;  %364 = vmatprep.subr.bf16.mxu1 %v476_v0 }
  0x49   :  { %345 = vmatpush3.bf16.msra.mxu0 %v387_v7  ;;  %365 = vmatpush3.bf16.msra.mxu1 %v395_v12 }
  0x4a   :  { %346 = vmatprep.subr.bf16.mxu0 %v476_v0  ;;  %366 = vmatprep.subr.bf16.mxu1 %v476_v0 }
  0x4d   :  { %347 = vmatpush3.bf16.msra.mxu0 %v388_v9  ;;  %367 = vmatpush3.bf16.msra.mxu1 %v396_v15 }
  0x4e   :  { %348 = vmatprep.subr.bf16.mxu0 %v476_v0  ;;  %368 = vmatprep.subr.bf16.mxu1 %v476_v0 }
  0x51   :  { %349 = vmatpush3.bf16.msra.mxu0 %v389_v11  ;;  %369 = vmatpush3.bf16.msra.mxu1 %v397_v17 }
  0x52   :  { %350 = vmatprep.subr.bf16.mxu0 %v476_v0  ;;  %370 = vmatprep.subr.bf16.mxu1 %v476_v0 }
  0x55   :  { %351 = vmatpush3.bf16.msra.mxu0 %v390_v13  ;;  %371 = vmatpush3.bf16.msra.mxu1 %v398_v18 }
  0x58   :  { %353 = vmatmul.mubr.bf16.vlgmr.msra.gmra.mrb[0].mxu0 %v61_v16 }
 0x12b   :  { %v167_v20 = vpop.f32.mrb[0].mxu0 }
 0x12c   :  { %v168_v21 = vadd.f32 %v300_v19, %v167_v20  ;;  %v354_v22 = vpop.f32.mrb[1].mxu0 }
 0x12d   :  { %v170_v23 = vpop.f32.mrb[2].mxu0 }
 0x12e   :  { %v173_v24 = vmul.f32 0.2, %v168_v21  ;;  %v355_v25 = vpop.f32.mrb[3].mxu0 }
 0x130   :  { %v174_v26 = vmax.f32 %v168_v21, %v173_v24 }
 0x132   :  { %v175_v27 = vpack.c.bf16 %v174_v26, %v174_v26 }
 0x134   :  { %373 = vmatmul.mubr.bf16.vlgmr.msra.gmra.mrb[0].mxu1 %v175_v27 }
 0x207   :  { %v281_v29 = vpop.f32.mrb[0].mxu1 }
 0x208   :  { %v282_v30 = vadd.f32 %v309_v28, %v281_v29  ;;  %v374_v31 = vpop.f32.mrb[1].mxu1 }
 0x209   :  { %v284_v32 = vpop.f32.mrb[2].mxu1 }
 0x20a   :  { %v290_v33 = vmul.f32 1.442695, %v282_v30  ;;  %v375_v34 = vpop.f32.mrb[3].mxu1 }
 0x20c   :  { %399 = vpow2.f32 %v290_v33 }
 0x216   :  { %v400_v37 = vpop.eup %399 }
 0x217   :  { %v292_v38 = vsel %vm289_vm1, %v400_v37, %v282_v30 }
 0x218   :  { %293 = vst [vmem:[%s565_s5] sm:$0x3] %v292_v38 }
 0x219   :  { %298 = vsyncpa [#allocation3], 1 }
 0x21a   :  { %299 = vsyncpa [#allocation5], 1 }

</bundles_post_ra>
